<compile_context>
chip_gen: v7x
topology: tpu7x:2x2x1
jax: 0.10.0
libtpu: 0.0.40
codegen_flags: <defaults>
</compile_context>

<pallas_src>
import jax
import jax.numpy as jnp
from jax.experimental import pallas as pl
from jax.experimental.pallas import tpu as pltpu

_COMPUTE_DTYPE = jnp.bfloat16   # MXU input dtype; accumulation stays f32.


def _fused_matmul_bias_kernel(w_ref, a_ref, b_ref, o_ref):
    # o = W @ A + b   (bias broadcast over lanes), f32 accumulation on the MXU.
    o_ref[...] = (
        jnp.dot(w_ref[...], a_ref[...], preferred_element_type=jnp.float32)
        + b_ref[...]
    )


def _pick_tile(m, tile_m, min_blocks):
    """Lane-dense M tile: multiple of 128, <= tile_m, aiming for >= min_blocks grid steps."""
    if m <= 128:
        return m                       # single full-extent block (exempt from the 128 rule)
    tile = pl.cdiv(pl.cdiv(m, min_blocks), 128) * 128
    return int(max(128, min(tile_m, tile)))


def fused_matmul_bias_t(w_t, a_t, b_col, *, tile_m=8192, min_blocks=4):
    """out = w_t @ a_t + b_col  (float32), lane-dense over M.

    w_t:   (Nout, K)   combined weight (transposed layout), bf16/f32
    a_t:   (K, M)      activations, M on the lane axis, bf16/f32
    b_col: (Nout, 1)   combined bias (f32, broadcast over lanes)
    returns (Nout, M) float32
    """
    nout, k = w_t.shape
    k2, m = a_t.shape
    assert k == k2 and b_col.shape == (nout, 1)

    tile = _pick_tile(m, tile_m, min_blocks)
    grid = pl.cdiv(m, tile)   # ragged last block: OOB reads unused, OOB writes dropped

    bytes_accessed = (
        k * m * a_t.dtype.itemsize           # activations (dominant stream)
        + grid * nout * k * w_t.dtype.itemsize
        + nout * m * 4                       # f32 output
        + nout * 4                           # bias
    )

    return pl.pallas_call(
        _fused_matmul_bias_kernel,
        out_shape=jax.ShapeDtypeStruct((nout, m), jnp.float32),
        grid=(grid,),
        in_specs=[
            pl.BlockSpec((nout, k), lambda i: (0, 0)),   # weight: replicated, full-extent
            pl.BlockSpec((k, tile), lambda i: (0, i)),   # activations: tiled over lanes
            pl.BlockSpec((nout, 1), lambda i: (0, 0)),   # bias: replicated
        ],
        out_specs=pl.BlockSpec((nout, tile), lambda i: (0, i)),
        compiler_params=pltpu.CompilerParams(
            dimension_semantics=("parallel",),           # shards M across TCs on v7x
        ),
        cost_estimate=pl.CostEstimate(
            flops=2 * nout * k * m,
            transcendentals=0,
            bytes_accessed=int(bytes_accessed),
        ),
    )(w_t, a_t, b_col)


@jax.jit
def model_forward(x, conv_w, conv_b, fc_w, fc_b):
    """Reproduces:
       v1  = Conv2d(3, 8, 1, stride=1, padding=1)(x)   # (N, 8, H+2, W+2)
       v2  = v1 + 0
       out = Linear(8, 2)(v2)                          # acts on the last (width) dim
    as ONE fused matmul (the model is purely linear, so this is exact up to bf16 inputs).
    """
    N, Cin, H, W = x.shape
    Cout = conv_w.shape[0]
    Kout, Win = fc_w.shape
    Hp, Wp = H + 2, W + 2
    # The PyTorch module only runs when the padded width equals fc1 in_features.
    assert Wp == Win, f"Linear over width requires W + 2 == {Win}, got W={W}"

    cw = conv_w.reshape(Cout, Cin)                                 # (Cout, Cin)

    # Combined weight (transposed): W_T[(o,k), (i,w)] = conv_w[o,i] * fc_w[k, w+1].
    # (Zero-padded width columns of the conv output multiply zeros -> dropped.)
    w_comb_t = jnp.einsum("oi,kw->okiw", cw, fc_w[:, 1:W + 1]).reshape(
        Cout * Kout, Cin * W)
    # Combined bias: the conv bias hits every one of the Wp width positions.
    b_comb = (conv_b[:, None] * jnp.sum(fc_w, axis=1)[None, :]
              + fc_b[None, :]).reshape(Cout * Kout, 1).astype(jnp.float32)

    # Activations: height-pad only (zero columns -> bias-only output rows), transpose so
    # the long M = N*Hp axis is lane-dense, and cast to bf16 (halves HBM traffic).
    # K = Cin*W = 18 stays unpadded: it equals the full block dim, so Mosaic pads
    # sublanes in VMEM for free instead of us burning an HBM pass on it.
    xpad_h = jnp.pad(x, ((0, 0), (0, 0), (1, 1), (0, 0)))               # (N, Cin, Hp, W)
    a_t = jnp.transpose(xpad_h, (1, 3, 0, 2)).reshape(Cin * W, N * Hp)  # (Cin*W, N*Hp)
    a_t = a_t.astype(_COMPUTE_DTYPE)
    w_t = w_comb_t.astype(_COMPUTE_DTYPE)

    out_t = fused_matmul_bias_t(w_t, a_t, b_comb)                   # (Cout*Kout, N*Hp) f32
    return out_t.reshape(Cout, Kout, N, Hp).transpose(2, 0, 3, 1)   # (N, Cout, Hp, Kout)


if __name__ == "__main__":
    key = jax.random.PRNGKey(0)
    k_x, k_cw, k_cb, k_fw, k_fb = jax.random.split(key, 5)

    # Small shapes consistent with the module: W = 6 so that W + 2 == 8 == fc in_features.
    # N=4, H=62 -> M = N*(H+2) = 256 -> two lane-dense 128-column blocks (2-step grid).
    N, Cin, H, W = 4, 3, 62, 6
    Cout, Kout = 8, 2

    x = jax.random.normal(k_x, (N, Cin, H, W), dtype=jnp.float32)

    # Deterministic parameter init (shapes match the PyTorch module).
    conv_w = 0.1 * jax.random.normal(k_cw, (Cout, Cin, 1, 1), dtype=jnp.float32)
    conv_b = 0.1 * jax.random.normal(k_cb, (Cout,), dtype=jnp.float32)
    fc_w = 0.1 * jax.random.normal(k_fw, (Kout, Cout), dtype=jnp.float32)
    fc_b = 0.1 * jax.random.normal(k_fb, (Kout,), dtype=jnp.float32)

    out = jax.block_until_ready(model_forward(x, conv_w, conv_b, fc_w, fc_b))

    # Pure-JAX f32 reference (two-step, unfused) for sanity.
    xpad = jnp.pad(x, ((0, 0), (0, 0), (1, 1), (1, 1)))
    v1_ref = (
        jnp.einsum("nihw,oi->nohw", xpad, conv_w.reshape(Cout, Cin))
        + conv_b[None, :, None, None]
    )
    ref = jnp.einsum("nohw,kw->nohk", v1_ref, fc_w) + fc_b

    assert out.shape == (N, Cout, H + 2, Kout)
    err = float(jnp.max(jnp.abs(out - ref)))
    # bf16 MXU inputs with f32 accumulation: typical error ~1e-3 at these magnitudes.
    assert err < 1e-2, f"max abs error {err}"

    print("KERNEL_OK")
</pallas_src>

<mosaic_0001>
module attributes {stable_mosaic.version = 11 : i64} {
  func.func @_fused_matmul_bias_kernel(%arg0: i32, %arg1: memref<16x18xbf16, #tpu.memory_space<vmem>>, %arg2: memref<18x128xbf16, #tpu.memory_space<vmem>>, %arg3: memref<16x1xf32, #tpu.memory_space<vmem>>, %arg4: memref<16x128xf32, #tpu.memory_space<vmem>>) attributes {dimension_semantics = [#tpu.dimension_semantics<parallel>], iteration_bounds = array<i64: 2>, scalar_prefetch = 0 : i64, scratch_operands = 0 : i64, tpu.core_type = #tpu.core_type<tc>, window_params = [{pipeline_mode = #tpu.pipeline_mode<synchronous>, transform_indices = @transform_0, window_bounds = array<i64: 16, 18>}, {transform_indices = @transform_1, window_bounds = array<i64: 18, 128>}, {pipeline_mode = #tpu.pipeline_mode<synchronous>, transform_indices = @transform_2, window_bounds = array<i64: 16, 1>}, {transform_indices = @transform_3, window_bounds = array<i64: 16, 128>}]} {
    %c0 = arith.constant 0 : index
    %c0_0 = arith.constant 0 : index
    %0 = vector.load %arg1[%c0, %c0_0] : memref<16x18xbf16, #tpu.memory_space<vmem>>, vector<16x18xbf16>
    %c0_1 = arith.constant 0 : index
    %c0_2 = arith.constant 0 : index
    %1 = vector.load %arg2[%c0_1, %c0_2] : memref<18x128xbf16, #tpu.memory_space<vmem>>, vector<18x128xbf16>
    %cst = arith.constant dense<0.000000e+00> : vector<16x128xf32>
    %2 = tpu.matmul %0, %1, %cst {dimension_numbers = #tpu.dot_dimension_numbers<[1], [0], [0], [1], [0, 0, 1, 1], [], []>} : vector<16x18xbf16>, vector<18x128xbf16>, vector<16x128xf32> -> vector<16x128xf32>
    %c0_3 = arith.constant 0 : index
    %c0_4 = arith.constant 0 : index
    %3 = vector.load %arg3[%c0_3, %c0_4] : memref<16x1xf32, #tpu.memory_space<vmem>>, vector<16x1xf32>
    %4 = vector.broadcast %3 : vector<16x1xf32> to vector<16x128xf32>
    %5 = arith.addf %2, %4 : vector<16x128xf32>
    %c0_5 = arith.constant 0 : index
    %c0_6 = arith.constant 0 : index
    %6 = vector.load %arg4[%c0_5, %c0_6] : memref<16x128xf32, #tpu.memory_space<vmem>>, vector<16x128xf32>
    tpu.vector_store %arg4[%c0_5, %c0_6], %5 {strides = array<i32>} : memref<16x128xf32, #tpu.memory_space<vmem>>, vector<16x128xf32>,
    return
  }
  func.func @transform_0(%arg0: i32) -> (i32, i32) {
    %c0_i32 = arith.constant 0 : i32
    %c0_i32_0 = arith.constant 0 : i32
    %c0_i32_1 = arith.constant 0 : i32
    return %c0_i32, %c0_i32_0 : i32, i32
  }
  func.func @transform_1(%arg0: i32) -> (i32, i32) {
    %c0_i32 = arith.constant 0 : i32
    %c0_i32_0 = arith.constant 0 : i32
    return %c0_i32, %arg0 : i32, i32
  }
  func.func @transform_2(%arg0: i32) -> (i32, i32) {
    %c0_i32 = arith.constant 0 : i32
    %c0_i32_0 = arith.constant 0 : i32
    %c0_i32_1 = arith.constant 0 : i32
    return %c0_i32, %c0_i32_0 : i32, i32
  }
  func.func @transform_3(%arg0: i32) -> (i32, i32) {
    %c0_i32 = arith.constant 0 : i32
    %c0_i32_0 = arith.constant 0 : i32
    return %c0_i32, %arg0 : i32, i32
  }
}

</mosaic_0001>

<bundles_post_ra>
// kernel: model_forward.1
= control target key start
LH: loop header
LB: loop body
LE: loop exit
PB: predicated region body
PF: predicated region fallthrough
CT: control target
= control target key end

     0   :  { %s504_s12 = smov 0   ;;  %s506_s13 = smov 0   ;;  %s573_s0 = inlined_call_operand.vmem [shape: bf16[16,18], index: 0, kind: input, shape index: {}]   ;;  %s574_s1 = inlined_call_operand.vmem [shape: bf16[18,256], index: 1, kind: input, shape index: {}]   ;;  %s575_s2 = inlined_call_operand.vmem [shape: f32[16,1], index: 2, kind: input, shape index: {}]   ;;  %s576_s3 = inlined_call_operand.vmem [shape: f32[16,256], index: 3, kind: output, shape index: {}]  }
   0x1   :  { %s508_s14 = smov 0  }
   0x2 LB: > { %s398_s15 = sadd.s32 4294967295, %s479_s14   ;;  %s521_s16 = sadd.s32 1, %s479_s14   ;;  %s479_s14 = sphi %s508_s14, %s580_s14   ;;  %s475_s13 = sphi %s506_s13, %s579_s13   ;;  %s471_s12 = sphi %s504_s12, %s578_s12  }
   0x3   : > { %s38_s17 = ssub.s32 %s479_s14, %s521_s16  ;;  %s41_s18 = sadd.s32 1, %s475_s13 }
   0x4   : > { %p39_p0 = scmp.eq.s32.totalorder %s38_s17, 0  ;;  %p48_p1 = scmp.ne.s32.totalorder %s475_s13, %s471_s12 }
   0x5   : > { %p49_p2 = scmp.eq.s32.totalorder %s479_s14, 0  ;;  %p99_p3 = scmp.eq.s32.totalorder %s398_s15, 1 }
   0x6   : > { %s532_s19 = scalar_select %p39_p0, %s475_s13, %s41_s18  }
   0x7   : > { %p50_p4 = por %p49_p2, %p48_p1  ;;  %p534_p5 = por %p99_p3, %p48_p1 }
   0x8   : > { %p401_p6 = scmp.ge.s32.totalorder %s479_s14, 2 }
   0xa   : > { %127 = sbr.rel (%p401_p6) target bundleno = 24 (0x18), region = 24 }
  0x11   : > { %130 = sbr.rel (!%p50_p4) target bundleno = 24 (0x18), region = 28  ;;  %s132_s21 = sand.u32 (%p50_p4), 1, %s475_s13  }
  0x12   : > { %s402_s22 = sshll.u32 (%p50_p4), %s479_s14, 2  ;;  %s424_s23 = smul.u32 (%p50_p4), 12, %s132_s21 }
  0x13   : > { %s136_s26 = scalar_lea.vmem (%p50_p4), %s574_s1, %s402_s22 }
  0x14   : > { %v152_v0 = vld [vmem:[%s136_s26] sm:$0xf] (%p50_p4)  ;;  %v154_v1 = vld [vmem:[%s136_s26 + $0x8] sm:$0xf] (%p50_p4)  ;;  %v156_v2 = vld [vmem:[%s136_s26 + $0x10] sm:$0xf] (%p50_p4) }
  0x15   : > { %s134_s27 = scalar_lea.vmem (%p50_p4), [#allocation2], %s424_s23 }
  0x16   : > { %153 = vst [vmem:[%s134_s27] sm:$0xf] (%p50_p4), %v152_v0  ;;  %155 = vst [vmem:[%s134_s27 + $0x4] sm:$0xf] (%p50_p4), %v154_v1 }
  0x17   : > { %157 = vst [vmem:[%s134_s27 + $0x8] sm:$0xf] (%p50_p4), %v156_v2 }
  0x18 PF: > { %p403_p7 = scmp.ge.s32.totalorder %s479_s14, 1  ;;  %p185_p8 = scmp.lt.s32.totalorder %s479_s14, 3 }
  0x1a   : > { %p186_p9 = pnand %p403_p7, %p185_p8 }
  0x1b   : > { %s192_s28 = sand.u32 (!%p186_p9), 1, %s471_s12   ;;  %v481_v3 = vmov (!%p186_p9), 0.0   ;;  %vm482_vm0 = vmmov (!%p186_p9), 0   ;;  %v483_v4 = vmov (!%p186_p9), 0   ;;  %v220_v5 = vld [vmem:[%s575_s2] sm:$0xff] (!%p186_p9)  ;;  %v221_v6 = vld [vmem:[%s575_s2 + $0x8] sm:$0xff] (!%p186_p9) }
  0x1c   : > { %189 = sbr.rel (%p186_p9) target bundleno = 265 (0x109), region = 69  ;;  %416 = vmatprep.subr.bf16.mxu0 (!%p186_p9), %v481_v3  ;;  %420 = vmatprep.mubr.msk.bf16.mxu0 (!%p186_p9), %vm482_vm0, %v481_v3  ;;  %vm250_vm1 = vcmask (!%p186_p9), 1040384   ;;  %v456_v10 = vld [vmem:[%s573_s0] sm:$0xff] (!%p186_p9)   ;;  %vm246_vm2 = vcmask (!%p186_p9), 146432   ;;  %s404_s10 = sshll.u32 (!%p186_p9), %s192_s28, 4 }
  0x1d   : > { %s425_s29 = smul.u32 (!%p186_p9), 12, %s192_s28  ;;  %453 = vset.pattern.permute.xlu0 (!%p186_p9), %v483_v4  ;;  %s213_s11 = scalar_lea.vmem (!%p186_p9), [#allocation3], %s404_s10 }
  0x1e   : > { %224 = vperm.xlu0 (!%p186_p9), %453, %v220_v5  }
  0x1f   : > { %s194_s7 = scalar_lea.vmem (!%p186_p9), [#allocation2], %s425_s29 }
  0x20   : > { %v454_v7 = vld [vmem:[%s194_s7] sm:$0xff] (!%p186_p9)   ;;  %v455_v8 = vld [vmem:[%s194_s7 + $0x8] ss:$0 sps:$4 sm:$0x11] (!%p186_p9)  }
  0x21   : > { %417 = vmatpush3.bf16.msra.mxu0 (!%p186_p9), %v454_v7  ;;  %v252_v9 = vsel (!%p186_p9), %vm250_vm1, %v455_v8, 0 }
  0x22   : > { %418 = vmatprep.subr.bf16.mxu0 (!%p186_p9), %v481_v3  ;;  %229 = vperm.xlu0 (!%p186_p9), %453, %v221_v6  }
  0x23   : > { %s410_s12 = sshll.u32 (%p534_p5), %s398_s15, 3 }
  0x24   : > { %s305_s21 = scalar_lea.vmem (%p534_p5), %s576_s3, %s410_s12 }
  0x25   : > { %419 = vmatpush3.bf16.msra.mxu0 %v252_v9 }
  0x28   : > { %421 = vmatmul.mubr.msk.bf16.vlgmr.msra.gmra.mrb[0].mxu0 %vm246_vm2, %v456_v10 }
  0x9d   : > { %v225_v11 = vpop.permute.xlu0 %224 }
  0xa1   : > { %v230_v15 = vpop.permute.xlu0 %229 }
  0xfa   : > { %303 = sbr.rel (!%p534_p5) target bundleno = 265 (0x109), region = 77 }
  0xfb   : > { %v288_v12 = vpop.f32.mrb[0].mxu0 }
  0xfc   : > { %v289_v13 = vadd.f32 %v288_v12, %v225_v11  ;;  %v422_v14 = vpop.f32.mrb[1].mxu0 }
  0xfd   : > { %v291_v16 = vpop.f32.mrb[2].mxu0 }
  0xfe   : > { %295 = vst [vmem:[%s213_s11] sm:$0xff] %v289_v13  ;;  %v292_v17 = vadd.f32 %v291_v16, %v230_v15  ;;  %v423_v18 = vpop.f32.mrb[3].mxu0 }
 0x100   : > { %296 = vst [vmem:[%s213_s11 + $0x8] sm:$0xff] %v292_v17 }
 0x105   : > { %v335_v19 = vld [vmem:[%s213_s11] sm:$0xff] }
 0x106   : > { %336 = vst [vmem:[%s305_s21] sm:$0xff] %v335_v19 }
 0x107   : > { %v337_v20 = vld [vmem:[%s213_s11 + $0x8] sm:$0xff] }
 0x108   : > { %338 = vst [vmem:[%s305_s21 + $0x10] sm:$0xff] %v337_v20 }
 0x109 PF: > { %p10_p10 = scmp.ge.s32.totalorder %s521_s16, 4   ;;  %s578_s12 = smov %s475_s13 }
 0x10a   : > { %s579_s13 = smov %s532_s19  ;;  %s580_s14 = smov %s521_s16 }
 0x10b   :  { %12 = sbr.rel (!%p10_p10) target bundleno = 2 (0x2), region = 146 }

</bundles_post_ra>
